<compile_context>
chip_gen: v7x
topology: tpu7x:2x2x1
jax: 0.10.0
libtpu: 0.0.40
codegen_flags: <defaults>
</compile_context>

<pallas_src>
import math

import jax
import jax.numpy as jnp
from jax import lax
from jax.experimental import pallas as pl
from jax.experimental.pallas import tpu as pltpu


# --------------------------------------------------------------------------- #
# Pallas kernel: one fused (box+cls) conv-as-matmul per feature level.
# --------------------------------------------------------------------------- #
def _fused_head_kernel(cols_ref, w_ref, b_ref, out_ref):
    """out = cols @ W_fused + b_fused   (one feature level per grid step)."""
    acc = jnp.dot(cols_ref[...], w_ref[...], preferred_element_type=jnp.float32)
    out_ref[...] = (acc + b_ref[...]).astype(out_ref.dtype)


# --------------------------------------------------------------------------- #
# Wrapper-side layout helpers (no FLOPs, just data movement).
# --------------------------------------------------------------------------- #
def _im2col_3x3(x_nhwc):
    """3x3 stride-1 'SAME' patches: (B,H,W,C) -> (B*H*W, 9*C), ordered (dy,dx,c)."""
    B, H, W, C = x_nhwc.shape
    xp = jnp.pad(x_nhwc, ((0, 0), (1, 1), (1, 1), (0, 0)))
    taps = [xp[:, dy:dy + H, dx:dx + W, :] for dy in range(3) for dx in range(3)]
    patches = jnp.stack(taps, axis=3)                      # (B, H, W, 9, C)
    return patches.reshape(B * H * W, 9 * C)


def _round_up(x, m):
    return (x + m - 1) // m * m


def ssd_head_forward(xs, params, num_anchors, num_classes):
    """
    xs:     list of NCHW feature maps; xs[l] has shape (B, C_l, H_l, W_l), f32.
    params: list of (w_loc, b_loc, w_cls, b_cls) per level; weights are stored
            HWIO: w_loc (3,3,C_l,A*4), w_cls (3,3,C_l,A*num_classes).
    Returns (loc_preds (B, sum_l H_l*W_l*A, 4),
             cls_preds (B, sum_l H_l*W_l*A, num_classes)),
    matching PyTorch SSDHead.forward (permute(0,2,3,1).view(B,-1,ndims) + cat).
    """
    A = num_anchors
    n_loc = A * 4
    n_cls = A * num_classes
    n_fused = n_loc + n_cls
    L = len(xs)
    B = xs[0].shape[0]

    # ---- pack every level into common zero-padded slabs --------------------
    cols_l, w_l, b_l, meta = [], [], [], []
    for x, (wl, bl, wc, bc) in zip(xs, params):
        _, C, H, W = x.shape
        x_nhwc = jnp.transpose(x, (0, 2, 3, 1)).astype(jnp.float32)
        cols = _im2col_3x3(x_nhwc)                                   # (B*H*W, 9*C)
        w_f = jnp.concatenate([wl, wc], axis=-1).reshape(9 * C, n_fused)
        b_f = jnp.concatenate([bl, bc], axis=0).reshape(1, n_fused)
        cols_l.append(cols)
        w_l.append(w_f)
        b_l.append(b_f)
        meta.append((H, W))

    Mmax = _round_up(max(c.shape[0] for c in cols_l), 8)
    Kmax = max(c.shape[1] for c in cols_l)
    Npad = _round_up(n_fused, 128)          # lane-dense output -> unmasked stores

    def pad2(a, rows, cols_):
        return jnp.pad(a, ((0, rows - a.shape[0]), (0, cols_ - a.shape[1])))

    cols_all = jnp.stack([pad2(c, Mmax, Kmax) for c in cols_l])      # (L,Mmax,Kmax)
    w_all = jnp.stack([pad2(w, Kmax, Npad) for w in w_l])            # (L,Kmax,Npad)
    b_all = jnp.stack([pad2(b, 1, Npad) for b in b_l])               # (L,1,Npad)

    cost = pl.CostEstimate(
        flops=2 * L * Mmax * Kmax * Npad,
        transcendentals=0,
        bytes_accessed=4 * int(cols_all.size + w_all.size + b_all.size
                               + L * Mmax * Npad),
    )

    out = pl.pallas_call(
        _fused_head_kernel,
        out_shape=jax.ShapeDtypeStruct((L, Mmax, Npad), jnp.float32),
        grid_spec=pltpu.PrefetchScalarGridSpec(
            num_scalar_prefetch=0,
            grid=(L,),
            in_specs=[
                pl.BlockSpec((pl.Squeezed(), Mmax, Kmax), lambda l: (l, 0, 0)),
                pl.BlockSpec((pl.Squeezed(), Kmax, Npad), lambda l: (l, 0, 0)),
                pl.BlockSpec((pl.Squeezed(), 1, Npad), lambda l: (l, 0, 0)),
            ],
            out_specs=pl.BlockSpec((pl.Squeezed(), Mmax, Npad),
                                   lambda l: (l, 0, 0)),
        ),
        compiler_params=pltpu.CompilerParams(
            dimension_semantics=("arbitrary",)),   # tiny work: keep on one TC
        cost_estimate=cost,
    )(cols_all, w_all, b_all)

    # ---- unpack: static lane-aligned slices + reshapes per level -----------
    loc_list, cls_list = [], []
    for l, (H, W) in enumerate(meta):
        M = B * H * W
        o = out[l, :M, :n_fused].reshape(B, H, W, n_fused)
        loc_list.append(o[..., :n_loc].reshape(B, H * W * A, 4))
        cls_list.append(o[..., n_loc:].reshape(B, H * W * A, num_classes))
    return jnp.concatenate(loc_list, 1), jnp.concatenate(cls_list, 1)


# --------------------------------------------------------------------------- #
# PyTorch-faithful parameter construction (Normal(0, 0.01) weights,
# loc bias = 0, cls bias from sigmoid_init / softmax_init).
# --------------------------------------------------------------------------- #
def make_params(key, in_channels_list, num_anchors, num_classes, act="sigmoid"):
    px = 0.99
    params = []
    keys = jax.random.split(key, len(in_channels_list))
    for k, c in zip(keys, in_channels_list):
        kl, kc = jax.random.split(k)
        w_loc = 0.01 * jax.random.normal(kl, (3, 3, c, num_anchors * 4), jnp.float32)
        b_loc = jnp.zeros((num_anchors * 4,), jnp.float32)
        w_cls = 0.01 * jax.random.normal(
            kc, (3, 3, c, num_anchors * num_classes), jnp.float32)
        b_cls = jnp.zeros((num_anchors, num_classes), jnp.float32)
        if act == "softmax":
            Kc = num_classes - 1
            bias_bg = math.log(Kc * px / (1 - px))
            b_cls = b_cls.at[:, 0].add(bias_bg)
        else:  # sigmoid_init: subtract bias_bg from every column
            bias_bg = math.log(px / (1 - px))
            b_cls = b_cls - bias_bg
        params.append((w_loc, b_loc, w_cls, b_cls.reshape(-1)))
    return params


# --------------------------------------------------------------------------- #
# Independent pure-JAX reference (lax conv) for the self-test.
# --------------------------------------------------------------------------- #
def ssd_head_reference(xs, params, num_anchors, num_classes):
    A = num_anchors
    dn = ("NHWC", "HWIO", "NHWC")
    locs, clss = [], []
    for x, (wl, bl, wc, bc) in zip(xs, params):
        xh = jnp.transpose(x, (0, 2, 3, 1))
        yl = lax.conv_general_dilated(xh, wl, (1, 1), "SAME",
                                      dimension_numbers=dn) + bl
        yc = lax.conv_general_dilated(xh, wc, (1, 1), "SAME",
                                      dimension_numbers=dn) + bc
        B, H, W, _ = yl.shape
        locs.append(yl.reshape(B, H * W * A, 4))
        clss.append(yc.reshape(B, H * W * A, num_classes))
    return jnp.concatenate(locs, 1), jnp.concatenate(clss, 1)


if __name__ == "__main__":
    key = jax.random.PRNGKey(0)
    kx0, kx1, kp = jax.random.split(key, 3)

    B = 2
    num_anchors = 3
    num_classes = 6
    in_channels_list = [8, 4]
    spatial_list = [16, 8]

    xs = [
        jax.random.normal(
            kx0, (B, in_channels_list[0], spatial_list[0], spatial_list[0]),
            jnp.float32),
        jax.random.normal(
            kx1, (B, in_channels_list[1], spatial_list[1], spatial_list[1]),
            jnp.float32),
    ]
    params = make_params(kp, in_channels_list, num_anchors, num_classes,
                         act="sigmoid")

    loc_preds, cls_preds = ssd_head_forward(xs, params, num_anchors, num_classes)
    jax.block_until_ready((loc_preds, cls_preds))

    loc_ref, cls_ref = ssd_head_reference(xs, params, num_anchors, num_classes)

    n_locs = sum(s * s * num_anchors for s in spatial_list)
    assert loc_preds.shape == (B, n_locs, 4)
    assert cls_preds.shape == (B, n_locs, num_classes)
    assert jnp.allclose(loc_preds, loc_ref, atol=1e-4, rtol=1e-4)
    assert jnp.allclose(cls_preds, cls_ref, atol=1e-4, rtol=1e-4)

    # TODO(synk): SSDHead.probas (inference-time sigmoid/softmax) is not part of
    # forward(); left to the caller.
    print("KERNEL_OK")
</pallas_src>

<mosaic_0001>
module attributes {stable_mosaic.version = 11 : i64} {
  func.func @_fused_head_kernel(%arg0: i32, %arg1: memref<1x512x72xf32, #tpu.memory_space<vmem>>, %arg2: memref<1x72x128xf32, #tpu.memory_space<vmem>>, %arg3: memref<1x1x128xf32, #tpu.memory_space<vmem>>, %arg4: memref<1x512x128xf32, #tpu.memory_space<vmem>>) attributes {dimension_semantics = [#tpu.dimension_semantics<arbitrary>], iteration_bounds = array<i64: 2>, scalar_prefetch = 0 : i64, scratch_operands = 0 : i64, tpu.core_type = #tpu.core_type<tc>, window_params = [{transform_indices = @transform_0, window_bounds = array<i64: 1, 512, 72>}, {transform_indices = @transform_1, window_bounds = array<i64: 1, 72, 128>}, {transform_indices = @transform_2, window_bounds = array<i64: 1, 1, 128>}, {transform_indices = @transform_3, window_bounds = array<i64: 1, 512, 128>}]} {
    %c0 = arith.constant 0 : index
    %c0_0 = arith.constant 0 : index
    %c0_1 = arith.constant 0 : index
    %0 = vector.load %arg1[%c0, %c0_0, %c0_1] : memref<1x512x72xf32, #tpu.memory_space<vmem>>, vector<1x512x72xf32>
    %1 = vector.shape_cast %0 : vector<1x512x72xf32> to vector<512x72xf32>
    %c0_2 = arith.constant 0 : index
    %c0_3 = arith.constant 0 : index
    %c0_4 = arith.constant 0 : index
    %2 = vector.load %arg2[%c0_2, %c0_3, %c0_4] : memref<1x72x128xf32, #tpu.memory_space<vmem>>, vector<1x72x128xf32>
    %3 = vector.shape_cast %2 : vector<1x72x128xf32> to vector<72x128xf32>
    %cst = arith.constant dense<0.000000e+00> : vector<512x128xf32>
    %4 = tpu.matmul %1, %3, %cst {dimension_numbers = #tpu.dot_dimension_numbers<[1], [0], [0], [1], [0, 0, 1, 1], [], []>} : vector<512x72xf32>, vector<72x128xf32>, vector<512x128xf32> -> vector<512x128xf32>
    %c0_5 = arith.constant 0 : index
    %c0_6 = arith.constant 0 : index
    %c0_7 = arith.constant 0 : index
    %5 = vector.load %arg3[%c0_5, %c0_6, %c0_7] : memref<1x1x128xf32, #tpu.memory_space<vmem>>, vector<1x1x128xf32>
    %6 = vector.shape_cast %5 : vector<1x1x128xf32> to vector<1x128xf32>
    %7 = vector.broadcast %6 : vector<1x128xf32> to vector<512x128xf32>
    %8 = arith.addf %4, %7 : vector<512x128xf32>
    %c0_8 = arith.constant 0 : index
    %c0_9 = arith.constant 0 : index
    %c0_10 = arith.constant 0 : index
    %9 = vector.load %arg4[%c0_8, %c0_9, %c0_10] : memref<1x512x128xf32, #tpu.memory_space<vmem>>, vector<1x512x128xf32>
    %10 = vector.shape_cast %9 : vector<1x512x128xf32> to vector<512x128xf32>
    %11 = vector.shape_cast %8 : vector<512x128xf32> to vector<1x512x128xf32>
    tpu.vector_store %arg4[%c0_8, %c0_9, %c0_10], %11 {strides = array<i32>} : memref<1x512x128xf32, #tpu.memory_space<vmem>>, vector<1x512x128xf32>,
    return
  }
  func.func @transform_0(%arg0: i32) -> (i32, i32, i32) {
    %c0_i32 = arith.constant 0 : i32
    %c0_i32_0 = arith.constant 0 : i32
    %c0_i32_1 = arith.constant 0 : i32
    return %arg0, %c0_i32, %c0_i32_0 : i32, i32, i32
  }
  func.func @transform_1(%arg0: i32) -> (i32, i32, i32) {
    %c0_i32 = arith.constant 0 : i32
    %c0_i32_0 = arith.constant 0 : i32
    %c0_i32_1 = arith.constant 0 : i32
    return %arg0, %c0_i32, %c0_i32_0 : i32, i32, i32
  }
  func.func @transform_2(%arg0: i32) -> (i32, i32, i32) {
    %c0_i32 = arith.constant 0 : i32
    %c0_i32_0 = arith.constant 0 : i32
    %c0_i32_1 = arith.constant 0 : i32
    return %arg0, %c0_i32, %c0_i32_0 : i32, i32, i32
  }
  func.func @transform_3(%arg0: i32) -> (i32, i32, i32) {
    %c0_i32 = arith.constant 0 : i32
    %c0_i32_0 = arith.constant 0 : i32
    %c0_i32_1 = arith.constant 0 : i32
    return %arg0, %c0_i32, %c0_i32_0 : i32, i32, i32
  }
}

</mosaic_0001>

<bundles_post_ra>
// kernel: tpu_custom_call.1
= control target key start
LH: loop header
LB: loop body
LE: loop exit
PB: predicated region body
PF: predicated region fallthrough
CT: control target
= control target key end

     0   :  { %8 = vsyncpa [#allocation3], 0  ;;  %s1836_s0 = inlined_call_operand.vmem [shape: f32[2,512,72], index: 0, kind: input, shape index: {}]   ;;  %s1837_s1 = inlined_call_operand.vmem [shape: f32[2,72,128], index: 1, kind: input, shape index: {}]   ;;  %s1838_s2 = inlined_call_operand.vmem [shape: f32[2,1,128], index: 2, kind: input, shape index: {}]   ;;  %s1839_s3 = inlined_call_operand.hbm [shape: f32[2,512,128], index: 3, kind: output, shape index: {}]  }
   0x1   :  { %10 = vsyncpa [#allocation3 + $0x1], 0  ;;  %s1444_s12 = smov 0   ;;  %s1446_s13 = smov 0  }
   0x2   :  { %s1448_s14 = smov 0   ;;  %s1450_s15 = smov 0  }
   0x3 LB: > { %s1465_s16 = sadd.s32 4294967295, %s1419_s15   ;;  %s1022_s17 = sadd.s32 4294967294, %s1419_s15   ;;  %s1419_s15 = sphi %s1450_s15, %s1845_s15   ;;  %s1415_s14 = sphi %s1448_s14, %s1844_s14   ;;  %s1411_s13 = sphi %s1446_s13, %s1843_s13   ;;  %s1407_s12 = sphi %s1444_s12, %s1842_s12  }
   0x4   : > { %s1469_s18 = sadd.s32 1, %s1419_s15   ;;  %s101_s19 = sadd.s32 1, %s1415_s14 }
   0x5   : > { %s98_s20 = ssub.s32 %s1419_s15, %s1469_s18  ;;  %p111_p0 = scmp.ne.s32.totalorder %s1415_s14, %s1411_s13 }
   0x6   : > { %p99_p1 = scmp.eq.s32.totalorder %s98_s20, 0  ;;  %p112_p2 = scmp.eq.s32.totalorder %s1465_s16, 1 }
   0x7   : > { %p117_p3 = scmp.ne.s32.totalorder %s1411_s13, %s1407_s12  ;;  %p118_p4 = scmp.eq.s32.totalorder %s1022_s17, 1 }
   0x8   : > { %s1480_s21 = scalar_select %p99_p1, %s1415_s14, %s101_s19  }
   0x9   : > { %p1482_p5 = por %p112_p2, %p111_p0  ;;  %p1486_p6 = por %p118_p4, %p117_p3 }
   0xa   : > { %p1025_p7 = scmp.ge.s32.totalorder %s1419_s15, 1  ;;  %p158_p8 = scmp.lt.s32.totalorder %s1419_s15, 3 }
   0xc   : > { %p159_p9 = pnand %p1025_p7, %p158_p8 }
   0xd   : > { %p190_p10 = scmp.lt.s32.totalorder (!%p159_p9), %s1465_s16, 1  ;;  %vm283_vm0 = vcmask (!%p159_p9), 588800   ;;  %s187_s6 = sand.u32 (!%p159_p9), 1, %s1411_s13  }
   0xe   : > { %162 = sbr.rel (%p159_p9) target bundleno = 338 (0x152), region = 32  ;;  %s1026_s10 = sshll.u32 (!%p159_p9), %s187_s6, 9 }
   0xf   : > { %s1658_s11 = scalar_lea.vmem (!%p159_p9), [#allocation2], %s1026_s10  ;;  %s1101_s17 = sshll.u32 (!%p159_p9), %s1465_s16, 13 }
  0x10   : > { %s939_s19 = sshll.u32 (!%p159_p9), %s1658_s11, 4  ;;  %s1421_s27 = smov (!%p159_p9), [#allocation2]   ;;  %s1785_s19 = int_to_ptr.vmem [resolvable:$true] %s939_s19 }
  0x11   : > { %s1361_s28 = sshll.u32 (!%p159_p9), %s1421_s27, 4  ;;  %s1362_s28 = int_to_ptr.vmem [resolvable:$false] %s1361_s28 }
  0x12   : > { %p1364_p0 = scmp.lt.s32.totalorder (!%p159_p9), %s1785_s19, %s1362_s28 }
  0x15   : > { %s1494_s24 = scalar_select %p190_p10, %s1465_s16, 1 }
  0x17   : > { %s1100_s25 = sshll.u32 %s1494_s24, 9  ;;  %s1315_s26 = smul.u32 72, %s1494_s24 }
  0x18   : > { %s1501_s29 = scalar_lea.vmem %s1836_s0, %s1100_s25  ;;  %s202_s9 = scalar_lea.vmem %s1838_s2, %s1494_s24 }
  0x19   : > { %s1506_s5 = scalar_lea.vmem %s1837_s1, %s1315_s26  ;;  %v203_v0 = vld [vmem:[%s1501_s29] sm:$0xff]  ;;  %v204_v15 = vld [vmem:[%s1501_s29 + $0x8] sm:$0xff]  ;;  %v205_v17 = vld [vmem:[%s1501_s29 + $0x10] sm:$0xff]  ;;  %s1783_s24 = scalar_lea.hbm %s1839_s3, %s1101_s17 }
  0x1a   : > { %v235_v1 = vld [vmem:[%s1501_s29 + $0x100] sm:$0xff]  ;;  %v268_v3 = vld [vmem:[%s1506_s5 + $0x8] sm:$0xff]  ;;  %v269_v4 = vld [vmem:[%s1506_s5 + $0x10] sm:$0xff]  ;;  %1193 = vmatprep.mubr.msk.f32.mxu0 %vm283_vm0, %v203_v0  ;;  %s1795_s25 = scalar_lea.sflag [#allocation3], %s187_s6  ;;  %s1357_s26 = scalar_lea.vmem %s1785_s19, 8192 }
  0x1b   : > { %v267_v2 = vld [vmem:[%s1506_s5] sm:$0xff]  ;;  %1241 = vmatprep.mubr.msk.f32.mxu1 %vm283_vm0, %v235_v1  ;;  %v270_v6 = vld [vmem:[%s1506_s5 + $0x18] sm:$0xff]  ;;  %v272_v9 = vld [vmem:[%s1506_s5 + $0x28] sm:$0xff]  ;;  %p1358_p11 = scmp.ne.s32.totalorder %s1785_s19, %s1357_s26 }
  0x1c   : > { %v1289_v5 = vpack.c.bf16 %v268_v3, %v267_v2  ;;  %v1293_v7 = vpack.c.bf16 %v270_v6, %v269_v4  ;;  %v271_v8 = vld [vmem:[%s1506_s5 + $0x20] sm:$0xff]  ;;  %v273_v11 = vld [vmem:[%s1506_s5 + $0x30] sm:$0xff]  ;;  %v274_v12 = vld [vmem:[%s1506_s5 + $0x38] sm:$0xff] }
  0x1d   : > { %v1297_v10 = vpack.c.bf16 %v272_v9, %v271_v8  ;;  %v1301_v13 = vpack.c.bf16 %v274_v12, %v273_v11  ;;  %v275_v14 = vld [vmem:[%s1506_s5 + $0x40] sm:$0xff]  ;;  %v236_v16 = vld [vmem:[%s1501_s29 + $0x108] sm:$0xff]  ;;  %v237_v18 = vld [vmem:[%s1501_s29 + $0x110] sm:$0xff]  ;;  %p1359_p12 = pnand %p1358_p11, %p1482_p5 }
  0x1e   : > { %1290 = vmatprep.subr.bf16.mxu0 %v1289_v5  ;;  %1305 = vmatprep.subr.bf16.mxu1 %v1289_v5  ;;  %v206_v19 = vld [vmem:[%s1501_s29 + $0x18] sm:$0xff]  ;;  %v207_v21 = vld [vmem:[%s1501_s29 + $0x20] sm:$0xff]  ;;  %v208_v23 = vld [vmem:[%s1501_s29 + $0x28] sm:$0xff] }
  0x1f   : > { %1292 = vmatpush3.bf16.msra.mxu0 %v1289_v5  ;;  %1310 = vmatpush3.bf16.msra.mxu1 %v1289_v5  ;;  %v238_v20 = vld [vmem:[%s1501_s29 + $0x118] sm:$0xff]  ;;  %v239_v22 = vld [vmem:[%s1501_s29 + $0x120] sm:$0xff]  ;;  %v240_v24 = vld [vmem:[%s1501_s29 + $0x128] sm:$0xff]  ;;  %p1360_p13 = pneg %p1359_p12 }
  0x20   : > { %1294 = vmatprep.subr.bf16.mxu0 %v1293_v7  ;;  %1306 = vmatprep.subr.bf16.mxu1 %v1293_v7  ;;  %v209_v25 = vld [vmem:[%s1501_s29 + $0x30] sm:$0xff]  ;;  %v210_v27 = vld [vmem:[%s1501_s29 + $0x38] sm:$0xff]  ;;  %v211_v29 = vld [vmem:[%s1501_s29 + $0x40] sm:$0xff] }
  0x21   : > { %v241_v26 = vld [vmem:[%s1501_s29 + $0x130] sm:$0xff]  ;;  %v242_v28 = vld [vmem:[%s1501_s29 + $0x138] sm:$0xff]  ;;  %v243_v30 = vld [vmem:[%s1501_s29 + $0x140] sm:$0xff] }
  0x22   : > { %v212_v31 = vld [vmem:[%s1501_s29 + $0x48] sm:$0xff]  ;;  %v213_v33 = vld [vmem:[%s1501_s29 + $0x50] sm:$0xff]  ;;  %v214_v35 = vld [vmem:[%s1501_s29 + $0x58] sm:$0xff] }
  0x23   : > { %1296 = vmatpush3.bf16.msra.mxu0 %v1293_v7  ;;  %1311 = vmatpush3.bf16.msra.mxu1 %v1293_v7  ;;  %v244_v32 = vld [vmem:[%s1501_s29 + $0x148] sm:$0xff]  ;;  %v245_v34 = vld [vmem:[%s1501_s29 + $0x150] sm:$0xff]  ;;  %v246_v36 = vld [vmem:[%s1501_s29 + $0x158] sm:$0xff] }
  0x24   : > { %1298 = vmatprep.subr.bf16.mxu0 %v1297_v10  ;;  %1307 = vmatprep.subr.bf16.mxu1 %v1297_v10  ;;  %v215_v37 = vld [vmem:[%s1501_s29 + $0x60] sm:$0xff]  ;;  %v216_v39 = vld [vmem:[%s1501_s29 + $0x68] sm:$0xff]  ;;  %v217_v41 = vld [vmem:[%s1501_s29 + $0x70] sm:$0xff] }
  0x25   : > { %v247_v38 = vld [vmem:[%s1501_s29 + $0x160] sm:$0xff]  ;;  %v248_v40 = vld [vmem:[%s1501_s29 + $0x168] sm:$0xff]  ;;  %v249_v42 = vld [vmem:[%s1501_s29 + $0x170] sm:$0xff] }
  0x26   : > { %v218_v43 = vld [vmem:[%s1501_s29 + $0x78] sm:$0xff]  ;;  %v219_v45 = vld [vmem:[%s1501_s29 + $0x80] sm:$0xff]  ;;  %v220_v47 = vld [vmem:[%s1501_s29 + $0x88] sm:$0xff] }
  0x27   : > { %1300 = vmatpush3.bf16.msra.mxu0 %v1297_v10  ;;  %1312 = vmatpush3.bf16.msra.mxu1 %v1297_v10  ;;  %v250_v44 = vld [vmem:[%s1501_s29 + $0x178] sm:$0xff]  ;;  %v251_v46 = vld [vmem:[%s1501_s29 + $0x180] sm:$0xff]  ;;  %v252_v48 = vld [vmem:[%s1501_s29 + $0x188] sm:$0xff] }
  0x28   : > { %1302 = vmatprep.subr.bf16.mxu0 %v1301_v13  ;;  %1308 = vmatprep.subr.bf16.mxu1 %v1301_v13  ;;  %v221_v49 = vld [vmem:[%s1501_s29 + $0x90] sm:$0xff]  ;;  %v222_v51 = vld [vmem:[%s1501_s29 + $0x98] sm:$0xff]  ;;  %v223_v53 = vld [vmem:[%s1501_s29 + $0xa0] sm:$0xff] }
  0x29   : > { %v253_v50 = vld [vmem:[%s1501_s29 + $0x190] sm:$0xff]  ;;  %v254_v52 = vld [vmem:[%s1501_s29 + $0x198] sm:$0xff]  ;;  %v255_v54 = vld [vmem:[%s1501_s29 + $0x1a0] sm:$0xff] }
  0x2a   : > { %v224_v55 = vld [vmem:[%s1501_s29 + $0xa8] sm:$0xff]  ;;  %v225_v57 = vld [vmem:[%s1501_s29 + $0xb0] sm:$0xff]  ;;  %v226_v59 = vld [vmem:[%s1501_s29 + $0xb8] sm:$0xff] }
  0x2b   : > { %1304 = vmatpush3.bf16.msra.mxu0 %v1301_v13  ;;  %1313 = vmatpush3.bf16.msra.mxu1 %v1301_v13  ;;  %v256_v56 = vld [vmem:[%s1501_s29 + $0x1a8] sm:$0xff]  ;;  %v257_v58 = vld [vmem:[%s1501_s29 + $0x1b0] sm:$0xff]  ;;  %v258_v60 = vld [vmem:[%s1501_s29 + $0x1b8] sm:$0xff] }
  0x2c   : > { %1191 = vmatprep.subr.mxu0 %v275_v14  ;;  %1309 = vmatprep.subr.mxu1 %v275_v14  ;;  %v227_v61 = vld [vmem:[%s1501_s29 + $0xc0] sm:$0xff]  ;;  %v228_v63 = vld [vmem:[%s1501_s29 + $0xc8] sm:$0xff]  ;;  %v229_v1 = vld [vmem:[%s1501_s29 + $0xd0] sm:$0xff] }
  0x2d   : > { %v259_v62 = vld [vmem:[%s1501_s29 + $0x1c0] sm:$0xff]  ;;  %v260_v0 = vld [vmem:[%s1501_s29 + $0x1c8] sm:$0xff]  ;;  %v261_v2 = vld [vmem:[%s1501_s29 + $0x1d0] sm:$0xff] }
  0x2e   : > { %v230_v3 = vld [vmem:[%s1501_s29 + $0xd8] sm:$0xff]  ;;  %v231_v5 = vld [vmem:[%s1501_s29 + $0xe0] sm:$0xff]  ;;  %v232_v7 = vld [vmem:[%s1501_s29 + $0xe8] sm:$0xff] }
  0x2f   : > { %1192 = vmatpush3.msra.mxu0 %v275_v14  ;;  %1314 = vmatpush3.msra.mxu1 %v275_v14  ;;  %v262_v4 = vld [vmem:[%s1501_s29 + $0x1d8] sm:$0xff]  ;;  %v263_v6 = vld [vmem:[%s1501_s29 + $0x1e0] sm:$0xff]  ;;  %v264_v8 = vld [vmem:[%s1501_s29 + $0x1e8] sm:$0xff] }
  0x30   : > { %1194 = vmatmul.mubr.msk.f32.vlgmr.msra.gmra.mrb[0].mxu0 %vm283_vm0, %v204_v15  ;;  %1242 = vmatmul.mubr.msk.f32.vlgmr.msra.gmra.mrb[0].mxu1 %vm283_vm0, %v236_v16  ;;  %v233_v9 = vld [vmem:[%s1501_s29 + $0xf0] sm:$0xff]  ;;  %v234_v11 = vld [vmem:[%s1501_s29 + $0xf8] sm:$0xff]  ;;  %v1652_v13 = vld [vmem:[%s202_s9] ss:$0 sm:$0xff] }
  0x31   : > { %1196 = vmatprep.mubr.msk.f32.mxu0 %vm283_vm0, %v205_v17  ;;  %1244 = vmatprep.mubr.msk.f32.mxu1 %vm283_vm0, %v237_v18  ;;  %v265_v10 = vld [vmem:[%s1501_s29 + $0x1f0] sm:$0xff]  ;;  %v266_v12 = vld [vmem:[%s1501_s29 + $0x1f8] sm:$0xff]  ;;  %s1363_s29 = scalar_lea.vmem %s1362_s28, 16384 }
  0x32   : > { %p1365_p1 = scmp.lt.s32.totalorder %s1363_s29, %s1357_s26 }
  0x34   : > { %1197 = vmatmul.mubr.msk.f32.gmra.mrb[2].mxu0 %vm283_vm0, %v206_v19  ;;  %1245 = vmatmul.mubr.msk.f32.gmra.mrb[2].mxu1 %vm283_vm0, %v238_v20  ;;  %p1366_p2 = por %p1365_p1, %p1364_p0 }
  0x35   : > { %1199 = vmatprep.mubr.msk.f32.mxu0 %vm283_vm0, %v207_v21  ;;  %1247 = vmatprep.mubr.msk.f32.mxu1 %vm283_vm0, %v239_v22 }
  0x36   : > { %p1367_p3 = pnand %p1366_p2, %p1360_p13 }
  0x38   : > { %1200 = vmatmul.mubr.msk.f32.gmra.mrb[4].mxu0 %vm283_vm0, %v208_v23  ;;  %1248 = vmatmul.mubr.msk.f32.gmra.mrb[4].mxu1 %vm283_vm0, %v240_v24 }
  0x39   : > { %1202 = vmatprep.mubr.msk.f32.mxu0 %vm283_vm0, %v209_v25  ;;  %1250 = vmatprep.mubr.msk.f32.mxu1 %vm283_vm0, %v241_v26 }
  0x3c   : > { %1203 = vmatmul.mubr.msk.f32.gmra.mrb[6].mxu0 %vm283_vm0, %v210_v27  ;;  %1251 = vmatmul.mubr.msk.f32.gmra.mrb[6].mxu1 %vm283_vm0, %v242_v28 }
  0x3d   : > { %1205 = vmatprep.mubr.msk.f32.mxu0 %vm283_vm0, %v211_v29  ;;  %1253 = vmatprep.mubr.msk.f32.mxu1 %vm283_vm0, %v243_v30 }
  0x40   : > { %1206 = vmatmul.mubr.msk.f32.gmra.mrb[8].mxu0 %vm283_vm0, %v212_v31  ;;  %1254 = vmatmul.mubr.msk.f32.gmra.mrb[8].mxu1 %vm283_vm0, %v244_v32 }
  0x41   : > { %1208 = vmatprep.mubr.msk.f32.mxu0 %vm283_vm0, %v213_v33  ;;  %1256 = vmatprep.mubr.msk.f32.mxu1 %vm283_vm0, %v245_v34 }
  0x44   : > { %1209 = vmatmul.mubr.msk.f32.gmra.mrb[10].mxu0 %vm283_vm0, %v214_v35  ;;  %1257 = vmatmul.mubr.msk.f32.gmra.mrb[10].mxu1 %vm283_vm0, %v246_v36 }
  0x45   : > { %1211 = vmatprep.mubr.msk.f32.mxu0 %vm283_vm0, %v215_v37  ;;  %1259 = vmatprep.mubr.msk.f32.mxu1 %vm283_vm0, %v247_v38 }
  0x48   : > { %1212 = vmatmul.mubr.msk.f32.gmra.mrb[12].mxu0 %vm283_vm0, %v216_v39  ;;  %1260 = vmatmul.mubr.msk.f32.gmra.mrb[12].mxu1 %vm283_vm0, %v248_v40 }
  0x49   : > { %1214 = vmatprep.mubr.msk.f32.mxu0 %vm283_vm0, %v217_v41  ;;  %1262 = vmatprep.mubr.msk.f32.mxu1 %vm283_vm0, %v249_v42 }
  0x4c   : > { %1215 = vmatmul.mubr.msk.f32.gmra.mrb[14].mxu0 %vm283_vm0, %v218_v43  ;;  %1263 = vmatmul.mubr.msk.f32.gmra.mrb[14].mxu1 %vm283_vm0, %v250_v44 }
  0x4d   : > { %1217 = vmatprep.mubr.msk.f32.mxu0 %vm283_vm0, %v219_v45  ;;  %1265 = vmatprep.mubr.msk.f32.mxu1 %vm283_vm0, %v251_v46 }
  0x50   : > { %1218 = vmatmul.mubr.msk.f32.gmra.mrb[16].mxu0 %vm283_vm0, %v220_v47  ;;  %1266 = vmatmul.mubr.msk.f32.gmra.mrb[16].mxu1 %vm283_vm0, %v252_v48 }
  0x51   : > { %1220 = vmatprep.mubr.msk.f32.mxu0 %vm283_vm0, %v221_v49  ;;  %1268 = vmatprep.mubr.msk.f32.mxu1 %vm283_vm0, %v253_v50 }
  0x54   : > { %1221 = vmatmul.mubr.msk.f32.gmra.mrb[18].mxu0 %vm283_vm0, %v222_v51  ;;  %1269 = vmatmul.mubr.msk.f32.gmra.mrb[18].mxu1 %vm283_vm0, %v254_v52 }
  0x55   : > { %1223 = vmatprep.mubr.msk.f32.mxu0 %vm283_vm0, %v223_v53  ;;  %1271 = vmatprep.mubr.msk.f32.mxu1 %vm283_vm0, %v255_v54 }
  0x58   : > { %1224 = vmatmul.mubr.msk.f32.gmra.mrb[20].mxu0 %vm283_vm0, %v224_v55  ;;  %1272 = vmatmul.mubr.msk.f32.gmra.mrb[20].mxu1 %vm283_vm0, %v256_v56 }
  0x59   : > { %1226 = vmatprep.mubr.msk.f32.mxu0 %vm283_vm0, %v225_v57  ;;  %1274 = vmatprep.mubr.msk.f32.mxu1 %vm283_vm0, %v257_v58 }
  0x5c   : > { %1227 = vmatmul.mubr.msk.f32.gmra.mrb[22].mxu0 %vm283_vm0, %v226_v59  ;;  %1275 = vmatmul.mubr.msk.f32.gmra.mrb[22].mxu1 %vm283_vm0, %v258_v60 }
  0x5d   : > { %1229 = vmatprep.mubr.msk.f32.mxu0 %vm283_vm0, %v227_v61  ;;  %1277 = vmatprep.mubr.msk.f32.mxu1 %vm283_vm0, %v259_v62 }
  0x60   : > { %1230 = vmatmul.mubr.msk.f32.gmra.mrb[24].mxu0 %vm283_vm0, %v228_v63  ;;  %1278 = vmatmul.mubr.msk.f32.gmra.mrb[24].mxu1 %vm283_vm0, %v260_v0 }
  0x61   : > { %1232 = vmatprep.mubr.msk.f32.mxu0 %vm283_vm0, %v229_v1  ;;  %1280 = vmatprep.mubr.msk.f32.mxu1 %vm283_vm0, %v261_v2 }
  0x64   : > { %1233 = vmatmul.mubr.msk.f32.gmra.mrb[26].mxu0 %vm283_vm0, %v230_v3  ;;  %1281 = vmatmul.mubr.msk.f32.gmra.mrb[26].mxu1 %vm283_vm0, %v262_v4 }
  0x65   : > { %1235 = vmatprep.mubr.msk.f32.mxu0 %vm283_vm0, %v231_v5  ;;  %1283 = vmatprep.mubr.msk.f32.mxu1 %vm283_vm0, %v263_v6 }
  0x68   : > { %1236 = vmatmul.mubr.msk.f32.gmra.mrb[28].mxu0 %vm283_vm0, %v232_v7  ;;  %1284 = vmatmul.mubr.msk.f32.gmra.mrb[28].mxu1 %vm283_vm0, %v264_v8 }
  0x69   : > { %1238 = vmatprep.mubr.msk.f32.mxu0 %vm283_vm0, %v233_v9  ;;  %1286 = vmatprep.mubr.msk.f32.mxu1 %vm283_vm0, %v265_v10 }
  0x6c   : > { %1239 = vmatmul.mubr.msk.f32.gmra.mrb[30].mxu0 %vm283_vm0, %v234_v11  ;;  %1287 = vmatmul.mubr.msk.f32.gmra.mrb[30].mxu1 %vm283_vm0, %v266_v12 }
 0x103   : > { %v1195_v14 = vpop.f32.mrb[0].mxu0  ;;  %v1243_v15 = vpop.f32.mrb[0].mxu1 }
 0x104   : > { %v548_v16 = vadd.f32 %v1195_v14, %v1652_v13  ;;  %v708_v17 = vadd.f32 %v1243_v15, %v1652_v13  ;;  %v542_v18 = vpop.f32.mrb[1].mxu0  ;;  %v702_v19 = vpop.f32.mrb[1].mxu1 }
 0x105   : > { %v543_v20 = vadd.f32 %v1652_v13, %v542_v18  ;;  %v703_v21 = vadd.f32 %v1652_v13, %v702_v19 }
 0x106   : > { %862 = vst [vmem:[%s1658_s11 + $0x8] sm:$0xff] %v548_v16  ;;  %894 = vst [vmem:[%s1658_s11 + $0x108] sm:$0xff] %v708_v17 }
 0x107   : > { %861 = vst [vmem:[%s1658_s11] sm:$0xff] %v543_v20  ;;  %893 = vst [vmem:[%s1658_s11 + $0x100] sm:$0xff] %v703_v21  ;;  %v1198_v22 = vpop.f32.mrb[2].mxu0  ;;  %v1246_v23 = vpop.f32.mrb[2].mxu1 }
 0x108   : > { %v558_v24 = vadd.f32 %v1198_v22, %v1652_v13  ;;  %v718_v25 = vadd.f32 %v1246_v23, %v1652_v13  ;;  %v552_v26 = vpop.f32.mrb[3].mxu0  ;;  %v712_v27 = vpop.f32.mrb[3].mxu1 }
 0x109   : > { %v553_v28 = vadd.f32 %v1652_v13, %v552_v26  ;;  %v713_v29 = vadd.f32 %v1652_v13, %v712_v27 }
 0x10a   : > { %864 = vst [vmem:[%s1658_s11 + $0x18] sm:$0xff] %v558_v24  ;;  %896 = vst [vmem:[%s1658_s11 + $0x118] sm:$0xff] %v718_v25 }
 0x10b   : > { %863 = vst [vmem:[%s1658_s11 + $0x10] sm:$0xff] %v553_v28  ;;  %895 = vst [vmem:[%s1658_s11 + $0x110] sm:$0xff] %v713_v29  ;;  %v1201_v30 = vpop.f32.mrb[4].mxu0  ;;  %v1249_v31 = vpop.f32.mrb[4].mxu1 }
 0x10c   : > { %v568_v32 = vadd.f32 %v1201_v30, %v1652_v13  ;;  %v728_v33 = vadd.f32 %v1249_v31, %v1652_v13  ;;  %v562_v34 = vpop.f32.mrb[5].mxu0  ;;  %v722_v35 = vpop.f32.mrb[5].mxu1 }
 0x10d   : > { %v563_v36 = vadd.f32 %v1652_v13, %v562_v34  ;;  %v723_v37 = vadd.f32 %v1652_v13, %v722_v35 }
 0x10e   : > { %866 = vst [vmem:[%s1658_s11 + $0x28] sm:$0xff] %v568_v32  ;;  %898 = vst [vmem:[%s1658_s11 + $0x128] sm:$0xff] %v728_v33 }
 0x10f   : > { %865 = vst [vmem:[%s1658_s11 + $0x20] sm:$0xff] %v563_v36  ;;  %897 = vst [vmem:[%s1658_s11 + $0x120] sm:$0xff] %v723_v37  ;;  %v1204_v38 = vpop.f32.mrb[6].mxu0  ;;  %v1252_v39 = vpop.f32.mrb[6].mxu1 }
 0x110   : > { %v578_v40 = vadd.f32 %v1204_v38, %v1652_v13  ;;  %v738_v41 = vadd.f32 %v1252_v39, %v1652_v13  ;;  %v572_v42 = vpop.f32.mrb[7].mxu0  ;;  %v732_v43 = vpop.f32.mrb[7].mxu1 }
 0x111   : > { %v573_v44 = vadd.f32 %v1652_v13, %v572_v42  ;;  %v733_v45 = vadd.f32 %v1652_v13, %v732_v43 }
 0x112   : > { %868 = vst [vmem:[%s1658_s11 + $0x38] sm:$0xff] %v578_v40  ;;  %900 = vst [vmem:[%s1658_s11 + $0x138] sm:$0xff] %v738_v41 }
 0x113   : > { %867 = vst [vmem:[%s1658_s11 + $0x30] sm:$0xff] %v573_v44  ;;  %899 = vst [vmem:[%s1658_s11 + $0x130] sm:$0xff] %v733_v45  ;;  %v1207_v46 = vpop.f32.mrb[8].mxu0  ;;  %v1255_v47 = vpop.f32.mrb[8].mxu1 }
 0x114   : > { %v588_v48 = vadd.f32 %v1207_v46, %v1652_v13  ;;  %v748_v49 = vadd.f32 %v1255_v47, %v1652_v13  ;;  %v582_v50 = vpop.f32.mrb[9].mxu0  ;;  %v742_v51 = vpop.f32.mrb[9].mxu1 }
 0x115   : > { %v583_v52 = vadd.f32 %v1652_v13, %v582_v50  ;;  %v743_v53 = vadd.f32 %v1652_v13, %v742_v51 }
 0x116   : > { %870 = vst [vmem:[%s1658_s11 + $0x48] sm:$0xff] %v588_v48  ;;  %902 = vst [vmem:[%s1658_s11 + $0x148] sm:$0xff] %v748_v49 }
 0x117   : > { %869 = vst [vmem:[%s1658_s11 + $0x40] sm:$0xff] %v583_v52  ;;  %901 = vst [vmem:[%s1658_s11 + $0x140] sm:$0xff] %v743_v53  ;;  %v1210_v54 = vpop.f32.mrb[10].mxu0  ;;  %v1258_v55 = vpop.f32.mrb[10].mxu1 }
 0x118   : > { %v598_v56 = vadd.f32 %v1210_v54, %v1652_v13  ;;  %v758_v57 = vadd.f32 %v1258_v55, %v1652_v13  ;;  %v592_v58 = vpop.f32.mrb[11].mxu0  ;;  %v752_v59 = vpop.f32.mrb[11].mxu1 }
 0x119   : > { %v593_v60 = vadd.f32 %v1652_v13, %v592_v58  ;;  %v753_v61 = vadd.f32 %v1652_v13, %v752_v59 }
 0x11a   : > { %872 = vst [vmem:[%s1658_s11 + $0x58] sm:$0xff] %v598_v56  ;;  %904 = vst [vmem:[%s1658_s11 + $0x158] sm:$0xff] %v758_v57 }
 0x11b   : > { %871 = vst [vmem:[%s1658_s11 + $0x50] sm:$0xff] %v593_v60  ;;  %903 = vst [vmem:[%s1658_s11 + $0x150] sm:$0xff] %v753_v61  ;;  %v1213_v62 = vpop.f32.mrb[12].mxu0  ;;  %v1261_v63 = vpop.f32.mrb[12].mxu1 }
 0x11c   : > { %v608_v0 = vadd.f32 %v1213_v62, %v1652_v13  ;;  %v768_v1 = vadd.f32 %v1261_v63, %v1652_v13  ;;  %v602_v2 = vpop.f32.mrb[13].mxu0  ;;  %v762_v3 = vpop.f32.mrb[13].mxu1 }
 0x11d   : > { %v603_v4 = vadd.f32 %v1652_v13, %v602_v2  ;;  %v763_v5 = vadd.f32 %v1652_v13, %v762_v3 }
 0x11e   : > { %874 = vst [vmem:[%s1658_s11 + $0x68] sm:$0xff] %v608_v0  ;;  %906 = vst [vmem:[%s1658_s11 + $0x168] sm:$0xff] %v768_v1 }
 0x11f   : > { %873 = vst [vmem:[%s1658_s11 + $0x60] sm:$0xff] %v603_v4  ;;  %905 = vst [vmem:[%s1658_s11 + $0x160] sm:$0xff] %v763_v5  ;;  %v1216_v6 = vpop.f32.mrb[14].mxu0  ;;  %v1264_v7 = vpop.f32.mrb[14].mxu1 }
 0x120   : > { %v618_v8 = vadd.f32 %v1216_v6, %v1652_v13  ;;  %v778_v9 = vadd.f32 %v1264_v7, %v1652_v13  ;;  %v612_v10 = vpop.f32.mrb[15].mxu0  ;;  %v772_v11 = vpop.f32.mrb[15].mxu1 }
 0x121   : > { %v613_v12 = vadd.f32 %v1652_v13, %v612_v10  ;;  %v773_v14 = vadd.f32 %v1652_v13, %v772_v11 }
 0x122   : > { %876 = vst [vmem:[%s1658_s11 + $0x78] sm:$0xff] %v618_v8  ;;  %908 = vst [vmem:[%s1658_s11 + $0x178] sm:$0xff] %v778_v9 }
 0x123   : > { %875 = vst [vmem:[%s1658_s11 + $0x70] sm:$0xff] %v613_v12  ;;  %907 = vst [vmem:[%s1658_s11 + $0x170] sm:$0xff] %v773_v14  ;;  %v1219_v15 = vpop.f32.mrb[16].mxu0  ;;  %v1267_v16 = vpop.f32.mrb[16].mxu1 }
 0x124   : > { %v628_v17 = vadd.f32 %v1219_v15, %v1652_v13  ;;  %v788_v18 = vadd.f32 %v1267_v16, %v1652_v13  ;;  %v622_v19 = vpop.f32.mrb[17].mxu0  ;;  %v782_v20 = vpop.f32.mrb[17].mxu1 }
 0x125   : > { %v623_v21 = vadd.f32 %v1652_v13, %v622_v19  ;;  %v783_v22 = vadd.f32 %v1652_v13, %v782_v20 }
 0x126   : > { %878 = vst [vmem:[%s1658_s11 + $0x88] sm:$0xff] %v628_v17  ;;  %910 = vst [vmem:[%s1658_s11 + $0x188] sm:$0xff] %v788_v18 }
 0x127   : > { %877 = vst [vmem:[%s1658_s11 + $0x80] sm:$0xff] %v623_v21  ;;  %909 = vst [vmem:[%s1658_s11 + $0x180] sm:$0xff] %v783_v22  ;;  %v1222_v23 = vpop.f32.mrb[18].mxu0  ;;  %v1270_v24 = vpop.f32.mrb[18].mxu1 }
 0x128   : > { %v638_v25 = vadd.f32 %v1222_v23, %v1652_v13  ;;  %v798_v26 = vadd.f32 %v1270_v24, %v1652_v13  ;;  %v632_v27 = vpop.f32.mrb[19].mxu0  ;;  %v792_v28 = vpop.f32.mrb[19].mxu1 }
 0x129   : > { %v633_v29 = vadd.f32 %v1652_v13, %v632_v27  ;;  %v793_v30 = vadd.f32 %v1652_v13, %v792_v28 }
 0x12a   : > { %880 = vst [vmem:[%s1658_s11 + $0x98] sm:$0xff] %v638_v25  ;;  %912 = vst [vmem:[%s1658_s11 + $0x198] sm:$0xff] %v798_v26 }
 0x12b   : > { %879 = vst [vmem:[%s1658_s11 + $0x90] sm:$0xff] %v633_v29  ;;  %911 = vst [vmem:[%s1658_s11 + $0x190] sm:$0xff] %v793_v30  ;;  %v1225_v31 = vpop.f32.mrb[20].mxu0  ;;  %v1273_v32 = vpop.f32.mrb[20].mxu1 }
 0x12c   : > { %v648_v33 = vadd.f32 %v1225_v31, %v1652_v13  ;;  %v808_v34 = vadd.f32 %v1273_v32, %v1652_v13  ;;  %v642_v35 = vpop.f32.mrb[21].mxu0  ;;  %v802_v36 = vpop.f32.mrb[21].mxu1 }
 0x12d   : > { %v643_v37 = vadd.f32 %v1652_v13, %v642_v35  ;;  %v803_v38 = vadd.f32 %v1652_v13, %v802_v36 }
 0x12e   : > { %882 = vst [vmem:[%s1658_s11 + $0xa8] sm:$0xff] %v648_v33  ;;  %914 = vst [vmem:[%s1658_s11 + $0x1a8] sm:$0xff] %v808_v34 }
 0x12f   : > { %881 = vst [vmem:[%s1658_s11 + $0xa0] sm:$0xff] %v643_v37  ;;  %913 = vst [vmem:[%s1658_s11 + $0x1a0] sm:$0xff] %v803_v38  ;;  %v1228_v39 = vpop.f32.mrb[22].mxu0  ;;  %v1276_v40 = vpop.f32.mrb[22].mxu1 }
 0x130   : > { %v658_v41 = vadd.f32 %v1228_v39, %v1652_v13  ;;  %v818_v42 = vadd.f32 %v1276_v40, %v1652_v13  ;;  %v652_v43 = vpop.f32.mrb[23].mxu0  ;;  %v812_v44 = vpop.f32.mrb[23].mxu1 }
 0x131   : > { %v653_v45 = vadd.f32 %v1652_v13, %v652_v43  ;;  %v813_v46 = vadd.f32 %v1652_v13, %v812_v44 }
 0x132   : > { %884 = vst [vmem:[%s1658_s11 + $0xb8] sm:$0xff] %v658_v41  ;;  %916 = vst [vmem:[%s1658_s11 + $0x1b8] sm:$0xff] %v818_v42 }
 0x133   : > { %883 = vst [vmem:[%s1658_s11 + $0xb0] sm:$0xff] %v653_v45  ;;  %915 = vst [vmem:[%s1658_s11 + $0x1b0] sm:$0xff] %v813_v46  ;;  %v1231_v47 = vpop.f32.mrb[24].mxu0  ;;  %v1279_v48 = vpop.f32.mrb[24].mxu1 }
 0x134   : > { %v668_v49 = vadd.f32 %v1231_v47, %v1652_v13  ;;  %v828_v50 = vadd.f32 %v1279_v48, %v1652_v13  ;;  %v662_v51 = vpop.f32.mrb[25].mxu0  ;;  %v822_v52 = vpop.f32.mrb[25].mxu1 }
 0x135   : > { %v663_v53 = vadd.f32 %v1652_v13, %v662_v51  ;;  %v823_v54 = vadd.f32 %v1652_v13, %v822_v52 }
 0x136   : > { %886 = vst [vmem:[%s1658_s11 + $0xc8] sm:$0xff] %v668_v49  ;;  %918 = vst [vmem:[%s1658_s11 + $0x1c8] sm:$0xff] %v828_v50 }
 0x137   : > { %885 = vst [vmem:[%s1658_s11 + $0xc0] sm:$0xff] %v663_v53  ;;  %917 = vst [vmem:[%s1658_s11 + $0x1c0] sm:$0xff] %v823_v54  ;;  %v1234_v55 = vpop.f32.mrb[26].mxu0  ;;  %v1282_v56 = vpop.f32.mrb[26].mxu1 }
 0x138   : > { %v678_v57 = vadd.f32 %v1234_v55, %v1652_v13  ;;  %v838_v58 = vadd.f32 %v1282_v56, %v1652_v13  ;;  %v672_v59 = vpop.f32.mrb[27].mxu0  ;;  %v832_v60 = vpop.f32.mrb[27].mxu1 }
 0x139   : > { %v673_v61 = vadd.f32 %v1652_v13, %v672_v59  ;;  %v833_v62 = vadd.f32 %v1652_v13, %v832_v60 }
 0x13a   : > { %888 = vst [vmem:[%s1658_s11 + $0xd8] sm:$0xff] %v678_v57  ;;  %920 = vst [vmem:[%s1658_s11 + $0x1d8] sm:$0xff] %v838_v58 }
 0x13b   : > { %887 = vst [vmem:[%s1658_s11 + $0xd0] sm:$0xff] %v673_v61  ;;  %919 = vst [vmem:[%s1658_s11 + $0x1d0] sm:$0xff] %v833_v62  ;;  %v1237_v63 = vpop.f32.mrb[28].mxu0  ;;  %v1285_v0 = vpop.f32.mrb[28].mxu1 }
 0x13c   : > { %v688_v1 = vadd.f32 %v1237_v63, %v1652_v13  ;;  %v848_v2 = vadd.f32 %v1285_v0, %v1652_v13  ;;  %v682_v3 = vpop.f32.mrb[29].mxu0  ;;  %v842_v4 = vpop.f32.mrb[29].mxu1 }
 0x13d   : > { %v683_v5 = vadd.f32 %v1652_v13, %v682_v3  ;;  %v843_v6 = vadd.f32 %v1652_v13, %v842_v4 }
 0x13e   : > { %890 = vst [vmem:[%s1658_s11 + $0xe8] sm:$0xff] %v688_v1  ;;  %922 = vst [vmem:[%s1658_s11 + $0x1e8] sm:$0xff] %v848_v2 }
 0x13f   : > { %889 = vst [vmem:[%s1658_s11 + $0xe0] sm:$0xff] %v683_v5  ;;  %921 = vst [vmem:[%s1658_s11 + $0x1e0] sm:$0xff] %v843_v6  ;;  %v1240_v7 = vpop.f32.mrb[30].mxu0  ;;  %v1288_v8 = vpop.f32.mrb[30].mxu1 }
 0x140   : > { %v698_v9 = vadd.f32 %v1240_v7, %v1652_v13  ;;  %v858_v10 = vadd.f32 %v1288_v8, %v1652_v13  ;;  %v692_v11 = vpop.f32.mrb[31].mxu0  ;;  %v852_v12 = vpop.f32.mrb[31].mxu1 }
 0x141   : > { %v693_v14 = vadd.f32 %v1652_v13, %v692_v11  ;;  %v853_v15 = vadd.f32 %v1652_v13, %v852_v12 }
 0x142   : > { %892 = vst [vmem:[%s1658_s11 + $0xf8] sm:$0xff] %v698_v9  ;;  %924 = vst [vmem:[%s1658_s11 + $0x1f8] sm:$0xff] %v858_v10 }
 0x143   : > { %891 = vst [vmem:[%s1658_s11 + $0xf0] sm:$0xff] %v693_v14  ;;  %923 = vst [vmem:[%s1658_s11 + $0x1f0] sm:$0xff] %v853_v15 }
 0x144   : > { %1370 = shalt.err (!%p1367_p3)
}
 0x145   : > { %s1371_s30 = scalar_lea.hbm %s1783_s24, 8192  ;;  %s1375_s6 = scalar_lea.hbm %s1839_s3, 16384 }
 0x146   : > { %p1372_p4 = scmp.ne.s32.totalorder %s1783_s24, %s1371_s30  ;;  %p1376_p9 = scmp.lt.u32.totalorder %s1783_s24, %s1839_s3 }
 0x147   : > { %p1377_p10 = scmp.lt.u32.totalorder %s1375_s6, %s1371_s30  ;;  %p1379_p12 = scmp.lt.u32.totalorder %s1371_s30, %s1783_s24 }
 0x148   : > { %p1373_p7 = pnand %p1372_p4, %p1482_p5 }
 0x149   : > { %p1378_p11 = por %p1377_p10, %p1376_p9 }
 0x14a   : > { %p1374_p8 = pneg %p1373_p7 }
 0x14b   : > { %p1380_p13 = por %p1379_p12, %p1378_p11 }
 0x14d   : > { %p1381_p0 = pnand %p1380_p13, %p1374_p8 }
 0x14f   : > { %1384 = shalt.err (!%p1381_p0)
}
 0x150   : > { %s1422_s9 = smov 128   ;;  %s1423_s10 = smov 8  }
 0x151   : > { %1316 = dma.vmem_to_hbm [thread:$0]  (%p1482_p5), %s1785_s19, 8192, %s1783_s24, %s1795_s25, %s1422_s9, %s1422_s9, %s1423_s10  }
 0x152 PF: > { %p1322_p1 = scmp.ge.s32.totalorder %s1419_s15, 2  ;;  %s954_s11 = sand.u32 1, %s1407_s12  }
 0x153   : > { %s955_s17 = scalar_lea.sflag [#allocation3], %s954_s11 }
 0x154   : > { %p1319_p2 = pnand %p1322_p1, %p1486_p6 }
 0x156   : > { %1402 = dma.done.wait (!%p1319_p2), %s955_s17, 8192  }
 0x157   : > { %1404 = vsyncadd (!%p1319_p2), %s955_s17, 4294959104  ;;  %p13_p3 = scmp.ge.s32.totalorder %s1469_s18, 4   ;;  %s1842_s12 = smov %s1411_s13 }
 0x158   : > { %s1843_s13 = smov %s1415_s14  ;;  %s1844_s14 = smov %s1480_s21 }
 0x159   : > { %s1845_s15 = smov %s1469_s18  ;;  %15 = sbr.rel (!%p13_p3) target bundleno = 3 (0x3), region = 73 }
 0x160   :  { %960 = vsyncpa [#allocation3], 1 }
 0x161   :  { %962 = vsyncpa [#allocation3 + $0x1], 1 }

</bundles_post_ra>
